<compile_context>
chip_gen: v6e
topology: v6e:2x2x1
jax: 0.10.0
libtpu: 0.0.40
codegen_flags: <defaults>
</compile_context>

<pallas_src>
import functools

import jax
import jax.numpy as jnp
from jax.experimental import pallas as pl
from jax.experimental.pallas import tpu as pltpu


def _round_up(x, m):
    return ((x + m - 1) // m) * m


def se_kernel(x_ref, w1t_ref, w2t_ref, o_ref, *, inv_hw):
    # x_ref:   (Bt, C, HWp)  input tile (HWp lanes zero-padded past true HW)
    # w1t_ref: (C, Crp)      transpose of first Linear weight, Cr zero-padded
    # w2t_ref: (Crp, C)      transpose of second Linear weight
    xb = x_ref[...].astype(jnp.float32)                     # (Bt, C, HWp)

    # Squeeze: global average pool over the spatial lanes.  Padded lanes are
    # zero so the sum is exact; scale by 1 / true_HW folded as a constant.
    y = jnp.sum(xb, axis=-1) * inv_hw                       # (Bt, C) f32

    # Excitation: FC -> ReLU -> FC -> Sigmoid, batched over Bt rows (MXU M=Bt).
    h = jnp.dot(y, w1t_ref[...], preferred_element_type=jnp.float32)   # (Bt, Crp)
    h = jnp.maximum(h, 0.0)
    s = jnp.dot(h, w2t_ref[...], preferred_element_type=jnp.float32)   # (Bt, C)
    s = jax.nn.sigmoid(s)

    # Scale: broadcast per-channel gate over spatial lanes, store in out dtype.
    o_ref[...] = (xb * s[:, :, None]).astype(o_ref.dtype)


def se_layer(x_nchw, w1, w2):
    """x_nchw: (B, C, H, W); w1: (Cr, C); w2: (C, Cr) -- bias-free PyTorch Linear weights."""
    B, C, H, W = x_nchw.shape
    HW = H * W
    dtype = x_nchw.dtype
    itemsize = jnp.dtype(dtype).itemsize

    # Lane-dense spatial axis: pad HW up to a multiple of 128 with zeros.
    HWp = _round_up(HW, 128)

    # Pad the reduced (hidden) dim to a multiple of 8 (exact, see kernel doc).
    Cr = w1.shape[0]
    Crp = _round_up(max(Cr, 8), 8)

    # Batch tile: target ~4 MiB of input per grid step (fits double-buffered
    # in+out well under v7x's 64 MiB VMEM), but keep >=2 grid steps so the
    # batch axis can shard across both v7x TensorCores.
    bytes_per_batch = C * HWp * itemsize
    target_bytes = 4 * 1024 * 1024
    Bt = int(max(1, min(B, target_bytes // bytes_per_batch)))
    if Bt >= B and B >= 2:
        Bt = (B + 1) // 2
    Bp = _round_up(B, Bt)
    n_steps = Bp // Bt

    x = x_nchw.reshape(B, C, HW)
    x = jnp.pad(x, ((0, Bp - B), (0, 0), (0, HWp - HW)))

    w1t = jnp.pad(w1.T.astype(jnp.float32), ((0, 0), (0, Crp - Cr)))    # (C, Crp)
    w2t = jnp.pad(w2.T.astype(jnp.float32), ((0, Crp - Cr), (0, 0)))    # (Crp, C)

    kernel = functools.partial(se_kernel, inv_hw=float(1.0 / HW))

    out = pl.pallas_call(
        kernel,
        out_shape=jax.ShapeDtypeStruct((Bp, C, HWp), dtype),
        grid_spec=pltpu.PrefetchScalarGridSpec(
            num_scalar_prefetch=0,
            grid=(n_steps,),
            in_specs=[
                pl.BlockSpec((Bt, C, HWp), lambda b: (b, 0, 0)),
                pl.BlockSpec((C, Crp), lambda b: (0, 0)),
                pl.BlockSpec((Crp, C), lambda b: (0, 0)),
            ],
            out_specs=pl.BlockSpec((Bt, C, HWp), lambda b: (b, 0, 0)),
        ),
        compiler_params=pltpu.CompilerParams(
            dimension_semantics=("parallel",),
            vmem_limit_bytes=48 * 1024 * 1024,
        ),
    )(x, w1t, w2t)

    return out[:B, :, :HW].reshape(B, C, H, W)


def se_layer_ref(x, w1, w2):
    """Pure-JAX reference matching the PyTorch module (f32 compute)."""
    xf = x.astype(jnp.float32)
    y = jnp.mean(xf, axis=(2, 3))                         # (B, C)
    y = jnp.maximum(y @ w1.T.astype(jnp.float32), 0.0)    # (B, Cr)
    y = jax.nn.sigmoid(y @ w2.T.astype(jnp.float32))      # (B, C)
    return xf * y[:, :, None, None]


def _make_inputs(key, B, C, H, W, reduction, dtype):
    Cr = int(C / reduction)
    kx, k1, k2 = jax.random.split(key, 3)
    x = jax.random.normal(kx, (B, C, H, W), dtype=jnp.float32).astype(dtype)
    w1 = jax.random.normal(k1, (Cr, C), dtype=jnp.float32) * 0.1   # Linear(C -> Cr)
    w2 = jax.random.normal(k2, (C, Cr), dtype=jnp.float32) * 0.1   # Linear(Cr -> C)
    return x, w1, w2


if __name__ == "__main__":
    key = jax.random.PRNGKey(0)
    k_a, k_b, k_c = jax.random.split(key, 3)

    # Case 1: lane-aligned spatial size, f32.
    x, w1, w2 = _make_inputs(k_a, B=2, C=64, H=16, W=16, reduction=16, dtype=jnp.float32)
    out = jax.block_until_ready(se_layer(x, w1, w2))
    ref = se_layer_ref(x, w1, w2)
    assert out.shape == x.shape
    assert jnp.allclose(out, ref, atol=1e-5, rtol=1e-5)

    # Case 2: non-multiple-of-128 spatial size (7x7) exercises HW padding path.
    x, w1, w2 = _make_inputs(k_b, B=3, C=32, H=7, W=7, reduction=8, dtype=jnp.float32)
    out = jax.block_until_ready(se_layer(x, w1, w2))
    ref = se_layer_ref(x, w1, w2)
    assert out.shape == x.shape
    assert jnp.allclose(out, ref, atol=1e-5, rtol=1e-5)

    # Case 3: bf16 input with f32 accumulation inside the kernel.
    x, w1, w2 = _make_inputs(k_c, B=2, C=64, H=16, W=16, reduction=16, dtype=jnp.bfloat16)
    out = jax.block_until_ready(se_layer(x, w1, w2))
    ref = se_layer_ref(x, w1, w2)
    assert out.shape == x.shape
    assert jnp.allclose(out.astype(jnp.float32), ref, atol=5e-2, rtol=5e-2)

    print("KERNEL_OK")
</pallas_src>

<mosaic_0001>
module attributes {stable_mosaic.version = 11 : i64} {
  func.func @se_kernel(%arg0: i32, %arg1: memref<1x64x256xf32, #tpu.memory_space<vmem>>, %arg2: memref<64x8xf32, #tpu.memory_space<vmem>>, %arg3: memref<8x64xf32, #tpu.memory_space<vmem>>, %arg4: memref<1x64x256xf32, #tpu.memory_space<vmem>>) attributes {dimension_semantics = [#tpu.dimension_semantics<parallel>], iteration_bounds = array<i64: 2>, scalar_prefetch = 0 : i64, scratch_operands = 0 : i64, tpu.core_type = #tpu.core_type<tc>, window_params = [{transform_indices = @transform_0, window_bounds = array<i64: 1, 64, 256>}, {pipeline_mode = #tpu.pipeline_mode<synchronous>, transform_indices = @transform_1, window_bounds = array<i64: 64, 8>}, {pipeline_mode = #tpu.pipeline_mode<synchronous>, transform_indices = @transform_2, window_bounds = array<i64: 8, 64>}, {transform_indices = @transform_3, window_bounds = array<i64: 1, 64, 256>}]} {
    %c0 = arith.constant 0 : index
    %c0_0 = arith.constant 0 : index
    %c0_1 = arith.constant 0 : index
    %0 = vector.load %arg1[%c0, %c0_0, %c0_1] : memref<1x64x256xf32, #tpu.memory_space<vmem>>, vector<1x64x256xf32>
    %cst = arith.constant dense<0.000000e+00> : vector<1x64xf32>
    %1 = vector.multi_reduction <add>, %0, %cst [2] : vector<1x64x256xf32> to vector<1x64xf32>
    %cst_2 = arith.constant 3.906250e-03 : f32
    %2 = vector.broadcast %cst_2 : f32 to vector<1x64xf32>
    %3 = arith.mulf %1, %2 : vector<1x64xf32>
    %c0_3 = arith.constant 0 : index
    %c0_4 = arith.constant 0 : index
    %4 = vector.load %arg2[%c0_3, %c0_4] : memref<64x8xf32, #tpu.memory_space<vmem>>, vector<64x8xf32>
    %cst_5 = arith.constant dense<0.000000e+00> : vector<1x8xf32>
    %5 = tpu.matmul %3, %4, %cst_5 {dimension_numbers = #tpu.dot_dimension_numbers<[1], [0], [0], [1], [0, 0, 1, 1], [], []>} : vector<1x64xf32>, vector<64x8xf32>, vector<1x8xf32> -> vector<1x8xf32>
    %cst_6 = arith.constant 0.000000e+00 : f32
    %6 = vector.broadcast %cst_6 : f32 to vector<1x8xf32>
    %7 = arith.maximumf %5, %6 : vector<1x8xf32>
    %c0_7 = arith.constant 0 : index
    %c0_8 = arith.constant 0 : index
    %8 = vector.load %arg3[%c0_7, %c0_8] : memref<8x64xf32, #tpu.memory_space<vmem>>, vector<8x64xf32>
    %cst_9 = arith.constant dense<0.000000e+00> : vector<1x64xf32>
    %9 = tpu.matmul %7, %8, %cst_9 {dimension_numbers = #tpu.dot_dimension_numbers<[1], [0], [0], [1], [0, 0, 1, 1], [], []>} : vector<1x8xf32>, vector<8x64xf32>, vector<1x64xf32> -> vector<1x64xf32>
    %10 = arith.negf %9 : vector<1x64xf32>
    %11 = math.exp %10 : vector<1x64xf32>
    %cst_10 = arith.constant 1.000000e+00 : f32
    %12 = vector.broadcast %cst_10 : f32 to vector<1x64xf32>
    %13 = arith.addf %12, %11 : vector<1x64xf32>
    %14 = arith.divf %12, %13 : vector<1x64xf32>
    %15 = vector.shape_cast %14 : vector<1x64xf32> to vector<1x64x1xf32>
    %16 = vector.broadcast %15 : vector<1x64x1xf32> to vector<1x64x256xf32>
    %17 = arith.mulf %0, %16 : vector<1x64x256xf32>
    %c0_11 = arith.constant 0 : index
    %c0_12 = arith.constant 0 : index
    %c0_13 = arith.constant 0 : index
    %18 = vector.load %arg4[%c0_11, %c0_12, %c0_13] : memref<1x64x256xf32, #tpu.memory_space<vmem>>, vector<1x64x256xf32>
    tpu.vector_store %arg4[%c0_11, %c0_12, %c0_13], %17 {strides = array<i32>} : memref<1x64x256xf32, #tpu.memory_space<vmem>>, vector<1x64x256xf32>,
    return
  }
  func.func @transform_0(%arg0: i32) -> (i32, i32, i32) {
    %c0_i32 = arith.constant 0 : i32
    %c0_i32_0 = arith.constant 0 : i32
    %c0_i32_1 = arith.constant 0 : i32
    return %arg0, %c0_i32, %c0_i32_0 : i32, i32, i32
  }
  func.func @transform_1(%arg0: i32) -> (i32, i32) {
    %c0_i32 = arith.constant 0 : i32
    %c0_i32_0 = arith.constant 0 : i32
    %c0_i32_1 = arith.constant 0 : i32
    return %c0_i32, %c0_i32_0 : i32, i32
  }
  func.func @transform_2(%arg0: i32) -> (i32, i32) {
    %c0_i32 = arith.constant 0 : i32
    %c0_i32_0 = arith.constant 0 : i32
    %c0_i32_1 = arith.constant 0 : i32
    return %c0_i32, %c0_i32_0 : i32, i32
  }
  func.func @transform_3(%arg0: i32) -> (i32, i32, i32) {
    %c0_i32 = arith.constant 0 : i32
    %c0_i32_0 = arith.constant 0 : i32
    %c0_i32_1 = arith.constant 0 : i32
    return %arg0, %c0_i32, %c0_i32_0 : i32, i32, i32
  }
}

</mosaic_0001>

<bundles_post_ra>
// kernel: tpu_custom_call.1
= control target key start
LH: loop header
LB: loop body
LE: loop exit
PB: predicated region body
PF: predicated region fallthrough
CT: control target
= control target key end

     0   :  { %8 = vsyncpa [#allocation3], 0  ;;  %s1129_s0 = inlined_call_operand.hbm [shape: f32[2,64,256], index: 0, kind: input, shape index: {}]   ;;  %s1130_s1 = inlined_call_operand.vmem [shape: f32[64,8], index: 1, kind: input, shape index: {}]   ;;  %s1131_s2 = inlined_call_operand.vmem [shape: f32[8,64], index: 2, kind: input, shape index: {}]   ;;  %s1132_s3 = inlined_call_operand.hbm [shape: f32[2,64,256], index: 3, kind: output, shape index: {}]  }
   0x1   :  { %10 = vsyncpa [#allocation3 + $0x1], 0 }
   0x2   :  { %11 = vsyncpa [#allocation4], 0 }
   0x3   :  { %13 = vsyncpa [#allocation4 + $0x1], 0  ;;  %s849_s12 = smov 0   ;;  %s851_s13 = smov 0  }
   0x4   :  { %s853_s14 = smov 0   ;;  %s855_s15 = smov 0  }
   0x5 LB: > { %s870_s16 = sadd.s32 4294967295, %s819_s15   ;;  %s617_s17 = sadd.s32 4294967294, %s819_s15   ;;  %s819_s15 = sphi %s855_s15, %s1147_s15   ;;  %s815_s14 = sphi %s853_s14, %s1146_s14   ;;  %s811_s13 = sphi %s851_s13, %s1145_s13   ;;  %s807_s12 = sphi %s849_s12, %s1144_s12  }
   0x6   : > { %s874_s18 = sadd.s32 1, %s819_s15   ;;  %s26_s19 = sadd.s32 1, %s815_s14 }
   0x7   : > { %s23_s20 = ssub.s32 %s819_s15, %s874_s18  ;;  %p33_p0 = scmp.ne.s32.totalorder %s815_s14, %s811_s13 }
   0x8   : > { %p24_p1 = scmp.eq.s32.totalorder %s23_s20, 0  ;;  %p34_p2 = scmp.eq.s32.totalorder %s819_s15, 0 }
   0x9   : > { %p39_p3 = scmp.ne.s32.totalorder %s811_s13, %s807_s12  ;;  %p40_p4 = scmp.eq.s32.totalorder %s870_s16, 0 }
   0xa   : > { %s886_s21 = scalar_select %p24_p1, %s815_s14, %s26_s19  }
   0xb   : > { %p888_p5 = por %p34_p2, %p33_p0  ;;  %p892_p6 = por %p40_p4, %p39_p3 }
   0xc   : > { %p105_p7 = scmp.eq.s32.totalorder %s870_s16, 1  ;;  %p111_p8 = scmp.eq.s32.totalorder %s617_s17, 1 }
   0xd   : > { %s1136_s23 = scalar_select %p892_p6, 1, 0 }
   0xe   : > { %p683_p10 = scmp.lt.s32.totalorder %s819_s15, 2  ;;  %p899_p11 = por %p105_p7, %p33_p0 }
   0xf   : > { %p903_p12 = por %p111_p8, %p39_p3  ;;  %s137_s26 = sand.u32 1, %s815_s14  }
  0x10   : > { %s1137_s24 = scalar_select %p899_p11, 1, 0 }
  0x11   : > { %s1138_s25 = scalar_select %p903_p12, 1, 0 }
  0x12   : > { %s634_s27 = sshll.u32 %s819_s15, 11  ;;  %s620_s28 = sshll.u32 %s137_s26, 7 }
  0x13   : > { %s912_s4 = scalar_lea.hbm %s1129_s0, %s634_s27  ;;  %s141_s5 = scalar_lea.vmem [#allocation2], %s620_s28 }
  0x14   : > { %s148_s6 = sshll.u32 %s141_s5, 4  ;;  %p916_p13 = pnand %p683_p10, %p888_p5  ;;  %s920_s6 = int_to_ptr.vmem [resolvable:$true] %s148_s6 }
  0x15   : > { %s922_s8 = scalar_lea.sflag [#allocation3], %s137_s26  ;;  %s727_s9 = scalar_lea.hbm %s912_s4, 2048 }
  0x16   : > { %p728_p0 = scmp.ne.s32.totalorder %s912_s4, %s727_s9  ;;  %p729_p1 = pneg %p916_p13 }
  0x17   : > { %s732_s17 = scalar_lea.hbm %s1129_s0, 4096  ;;  %p733_p4 = scmp.lt.s32.totalorder %s912_s4, %s1129_s0 }
  0x18   : > { %p730_p2 = pnand %p729_p1, %p728_p0  ;;  %p734_p5 = scmp.lt.s32.totalorder %s732_s17, %s727_s9 }
  0x1a   : > { %p731_p3 = pneg %p730_p2  ;;  %p735_p7 = por %p734_p5, %p733_p4 }
  0x1c   : > { %p736_p8 = pnand %p735_p7, %p731_p3 }
  0x1e   : > { %739 = shalt.err (!%p736_p8)
}
  0x1f   : > { %s740_s22 = scalar_lea.vmem %s920_s6, 2048  ;;  %s821_s26 = smov [#allocation2]  }
  0x20   : > { %p741_p10 = scmp.ne.s32.totalorder %s920_s6, %s740_s22  ;;  %s745_s27 = sshll.u32 %s821_s26, 4  ;;  %s746_s27 = int_to_ptr.vmem [resolvable:$false] %s745_s27 }
  0x21   : > { %s747_s28 = scalar_lea.vmem %s746_s27, 4096  ;;  %p748_p2 = scmp.lt.s32.totalorder %s920_s6, %s746_s27 }
  0x22   : > { %p743_p9 = pnand %p741_p10, %p729_p1  ;;  %p749_p12 = scmp.lt.s32.totalorder %s747_s28, %s740_s22 }
  0x24   : > { %p744_p0 = pneg %p743_p9  ;;  %p750_p11 = por %p749_p12, %p748_p2 }
  0x26   : > { %p751_p6 = pnand %p750_p11, %p744_p0 }
  0x28   : > { %754 = shalt.err (!%p751_p6)
}
  0x29   : > { %s822_s29 = smov 256   ;;  %s823_s30 = smov 16  }
  0x2a   : > { %678 = dma.hbm_to_vmem [thread:$0]  (!%p916_p13), %s912_s4, 2048, %s920_s6, %s922_s8, %s822_s29, %s822_s29, %s823_s30  }
  0x2b   : > { %p623_p9 = scmp.ge.s32.totalorder %s819_s15, 1  ;;  %p156_p1 = scmp.lt.s32.totalorder %s819_s15, 3 }
  0x2d   : > { %p157_p3 = pnand %p623_p9, %p156_p1 }
  0x2e   : > { %s946_s5 = sand.u32 (!%p157_p3), 1, %s811_s13   ;;  %p1140_p6 = scmp.ne.s32.totalorder (!%p157_p3), %s1136_s23, 0 }
  0x2f   : > { %160 = sbr.rel (%p157_p3) target bundleno = 781 (0x30d), region = 32  ;;  %s624_s9 = sshll.u32 (!%p157_p3), %s946_s5, 7 }
  0x30   : > { %s163_s10 = scalar_lea.sflag (!%p157_p3), [#allocation3], %s946_s5  ;;  %s166_s11 = scalar_lea.vmem (!%p157_p3), [#allocation2], %s624_s9 }
  0x34   : > { %798 = dma.done.wait (%p1140_p6), %s163_s10, 2048  }
  0x35   : > { %800 = vsyncadd (%p1140_p6), %s163_s10, 4294965248  ;;  %v956_v0 = vld [vmem:[%s166_s11] sm:$0xff]  ;;  %v958_v1 = vld [vmem:[%s166_s11 + $0x8] sm:$0xff]  ;;  %v824_v24 = vmov 0.0   ;;  %vm825_vm0 = vmmov 0   ;;  %v253_v33 = vlaneseq  ;;  %vm264_vm1 = vcmask 130112  }
  0x36   : > { %v960_v2 = vld [vmem:[%s166_s11 + $0x20] sm:$0xff]  ;;  %v205_v3 = vadd.f32 %v958_v1, %v956_v0  ;;  %v964_v4 = vld [vmem:[%s166_s11 + $0x28] sm:$0xff]  ;;  %v966_v5 = vld [vmem:[%s166_s11 + $0x10] sm:$0xff]  ;;  %647 = vmatprep.subr.mxu0 %v824_v24  ;;  %666 = vmatprep.subr.mxu1 %v824_v24  ;;  %vm271_vm2 = vcmask 195712   ;;  %vm278_vm3 = vcmask 261312   ;;  %vm285_vm4 = vcmask 326912  }
  0x37   : > { %v968_v6 = vld [vmem:[%s166_s11 + $0x18] sm:$0xff]  ;;  %v211_v7 = vadd.f32 %v964_v4, %v960_v2  ;;  %v972_v8 = vld [vmem:[%s166_s11 + $0x30] sm:$0xff]  ;;  %v980_v12 = vld [vmem:[%s166_s11 + $0x40] sm:$0xff]  ;;  %663 = vmatprep.mubr.msk.f32.mxu0 %vm825_vm0, %v824_v24  ;;  %668 = vmatprep.mubr.msk.f32.mxu1 %vm825_vm0, %v824_v24  ;;  %v254_v34 = vand.u32 127, %v253_v33  ;;  %v1028_v35 = vshrl.u32 %v253_v33, 7  ;;  %vm292_vm5 = vcmask 392512  }
  0x38   : > { %v974_v9 = vld [vmem:[%s166_s11 + $0x38] sm:$0xff]  ;;  %206 = vadd.xlane.f32.xlu0 %v205_v3  ;;  %v208_v10 = vadd.f32 %v968_v6, %v966_v5  ;;  %v982_v13 = vld [vmem:[%s166_s11 + $0x48] sm:$0xff]  ;;  %v984_v14 = vld [vmem:[%s166_s11 + $0x50] sm:$0xff]  ;;  %vm299_vm6 = vcmask 458112   ;;  %vm306_vm7 = vcmask 523712   ;;  %vm308_vm8 = vcmask 523264  }
  0x39   : > { %212 = vadd.xlane.f32.xlu1 %v211_v7  ;;  %v214_v11 = vadd.f32 %v974_v9, %v972_v8  ;;  %v986_v15 = vld [vmem:[%s166_s11 + $0x58] sm:$0xff]  ;;  %v217_v16 = vadd.f32 %v982_v13, %v980_v12  ;;  %v992_v18 = vld [vmem:[%s166_s11 + $0x60] sm:$0xff]  ;;  %v994_v19 = vld [vmem:[%s166_s11 + $0x68] sm:$0xff]  ;;  %v259_v36 = vadd.s32 4294967288, %v254_v34  ;;  %v266_v38 = vadd.s32 4294967280, %v254_v34  ;;  %s1049_s6 = scalar_lea.vmem [#allocation5], %s624_s9 }
  0x3a   : > { %v220_v17 = vadd.f32 %v986_v15, %v984_v14  ;;  %v996_v20 = vld [vmem:[%s166_s11 + $0x70] sm:$0xff]  ;;  %v998_v21 = vld [vmem:[%s166_s11 + $0x78] sm:$0xff]  ;;  %v223_v22 = vadd.f32 %v994_v19, %v992_v18  ;;  %v242_v27 = vld [vmem:[%s1130_s1 + $0x28] sm:$0xff]  ;;  %v273_v39 = vadd.s32 4294967272, %v254_v34  ;;  %v257_v41 = vsub.s32 %v254_v34, %v1028_v35  ;;  %s635_s9 = sshll.u32 %s870_s16, 11  ;;  %s544_s7 = sshll.u32 %s1049_s6, 4  ;;  %s1082_s7 = int_to_ptr.vmem [resolvable:$true] %s544_s7 }
  0x3b   : > { %v226_v23 = vadd.f32 %v998_v21, %v996_v20  ;;  %v244_v25 = vld [vmem:[%s1130_s1 + $0x38] sm:$0xff]  ;;  %v243_v26 = vld [vmem:[%s1130_s1 + $0x30] sm:$0xff]  ;;  %v241_v28 = vld [vmem:[%s1130_s1 + $0x20] sm:$0xff]  ;;  %v262_v43 = vsub.s32 %v259_v36, %v1028_v35  ;;  %v280_v44 = vadd.s32 4294967264, %v254_v34  ;;  %v269_v45 = vsub.s32 %v266_v38, %v1028_v35  ;;  %s1080_s19 = scalar_lea.hbm %s1132_s3, %s635_s9  ;;  %s531_s16 = scalar_lea.sflag [#allocation4], %s946_s5 }
  0x3c   : > { %209 = vadd.xlane.f32.xlu0 %v208_v10  ;;  %648 = vmatpush3.msra.mxu0 %v244_v25  ;;  %v240_v29 = vld [vmem:[%s1130_s1 + $0x18] sm:$0xff]  ;;  %v239_v30 = vld [vmem:[%s1130_s1 + $0x10] sm:$0xff]  ;;  %v238_v31 = vld [vmem:[%s1130_s1 + $0x8] sm:$0xff]  ;;  %v276_v48 = vsub.s32 %v273_v39, %v1028_v35  ;;  %v287_v49 = vadd.s32 4294967256, %v254_v34  ;;  %v294_v56 = vadd.s32 4294967248, %v254_v34  ;;  %v301_v61 = vadd.s32 4294967240, %v254_v34 }
  0x3d   : > { %215 = vadd.xlane.f32.xlu1 %v214_v11  ;;  %649 = vmatprep.subr.mxu0 %v824_v24  ;;  %v237_v32 = vld [vmem:[%s1130_s1] sm:$0xff]  ;;  %v283_v55 = vsub.s32 %v280_v44, %v1028_v35  ;;  %vm383_vm9 = vcmask 64512   ;;  %v465_v44 = vsub.s32 0, %v1028_v35  ;;  %s755_s20 = scalar_lea.vmem %s1082_s7, 2048  ;;  %p1141_p12 = scmp.ne.s32.totalorder %s1137_s24, 0 }
  0x3e   : > { %650 = vmatpush3.msra.mxu0 %v243_v26  ;;  %v290_v60 = vsub.s32 %v287_v49, %v1028_v35  ;;  %v382_v34 = vld [vmem:[%s1131_s2] sm:$0xff]  ;;  %p756_p11 = scmp.ne.s32.totalorder %s1082_s7, %s755_s20  ;;  %s826_s22 = smov [#allocation5]  }
  0x3f   : > { %651 = vmatprep.subr.mxu0 %v824_v24  ;;  %667 = vmatpush3.msra.mxu1 %v382_v34  ;;  %s759_s26 = sshll.u32 %s826_s22, 4  ;;  %s760_s26 = int_to_ptr.vmem [resolvable:$false] %s759_s26 }
  0x40   : > { %218 = vadd.xlane.f32.xlu0 %v217_v16  ;;  %652 = vmatpush3.msra.mxu0 %v242_v27  ;;  %p757_p13 = pnand %p756_p11, %p1141_p12  ;;  %s761_s27 = scalar_lea.vmem %s760_s26, 4096 }
  0x41   : > { %221 = vadd.xlane.f32.xlu1 %v220_v17  ;;  %653 = vmatprep.subr.mxu0 %v824_v24  ;;  %v297_v17 = vsub.s32 %v294_v56, %v1028_v35  ;;  %p762_p5 = scmp.lt.s32.totalorder %s1082_s7, %s760_s26  ;;  %p763_p7 = scmp.lt.s32.totalorder %s761_s27, %s755_s20 }
  0x42   : > { %654 = vmatpush3.msra.mxu0 %v241_v28  ;;  %p758_p4 = pneg %p757_p13 }
  0x43   : > { %655 = vmatprep.subr.mxu0 %v824_v24  ;;  %p764_p8 = por %p763_p7, %p762_p5 }
  0x44   : > { %224 = vadd.xlane.f32.xlu0 %v223_v22  ;;  %656 = vmatpush3.msra.mxu0 %v240_v29 }
  0x45   : > { %227 = vadd.xlane.f32.xlu1 %v226_v23  ;;  %657 = vmatprep.subr.mxu0 %v824_v24  ;;  %p765_p10 = pnand %p764_p8, %p758_p4 }
  0x46   : > { %658 = vmatpush3.msra.mxu0 %v239_v30 }
  0x47   : > { %659 = vmatprep.subr.mxu0 %v824_v24 }
  0x48   : > { %660 = vmatpush3.msra.mxu0 %v238_v31 }
  0x49   : > { %661 = vmatprep.subr.mxu0 %v824_v24  ;;  %v304_v24 = vsub.s32 %v301_v61, %v1028_v35 }
  0x4a   : > { %662 = vmatpush3.msra.mxu0 %v237_v32 }
  0xc1   : > { %v207_v37 = vpop.xlane.xlu0 %206 }
  0xc2   : > { %v213_v40 = vpop.xlane.xlu1 %212  ;;  %v229_v42 = vmul.f32 0.00390625, %v207_v37 }
  0xc3   : > { %v231_v46 = vmul.f32 0.00390625, %v213_v40 }
  0xc4   : > { %v258_v53 = vrot.slane %v229_v42, %v257_v41 }
  0xc5   : > { %v210_v47 = vpop.xlane.xlu0 %209  ;;  %v270_v57 = vrot.slane %v231_v46, %v269_v45 }
  0xc6   : > { %v230_v50 = vmul.f32 0.00390625, %v210_v47  ;;  %v216_v51 = vpop.xlane.xlu1 %215 }
  0xc7   : > { %v232_v52 = vmul.f32 0.00390625, %v216_v51 }
  0xc8   : > { %v263_v54 = vrot.slane %v230_v50, %v262_v43 }
  0xc9   : > { %v277_v58 = vrot.slane %v232_v52, %v276_v48  ;;  %v219_v59 = vpop.xlane.xlu0 %218 }
  0xca   : > { %v265_v62 = vsel %vm264_vm1, %v263_v54, %v258_v53  ;;  %v233_v63 = vmul.f32 0.00390625, %v219_v59  ;;  %v222_v3 = vpop.xlane.xlu1 %221 }
  0xcb   : > { %v272_v7 = vsel %vm271_vm2, %v270_v57, %v265_v62  ;;  %v234_v10 = vmul.f32 0.00390625, %v222_v3 }
  0xcc   : > { %v279_v11 = vsel %vm278_vm3, %v277_v58, %v272_v7  ;;  %v284_v16 = vrot.slane %v233_v63, %v283_v55 }
  0xcd   : > { %v291_v22 = vrot.slane %v234_v10, %v290_v60  ;;  %v225_v23 = vpop.xlane.xlu0 %224 }
  0xce   : > { %v286_v25 = vsel %vm285_vm4, %v284_v16, %v279_v11  ;;  %v235_v26 = vmul.f32 0.00390625, %v225_v23  ;;  %v228_v27 = vpop.xlane.xlu1 %227 }
  0xcf   : > { %v236_v28 = vmul.f32 0.00390625, %v228_v27  ;;  %v293_v30 = vsel %vm292_vm5, %v291_v22, %v286_v25 }
  0xd0   : > { %v298_v29 = vrot.slane %v235_v26, %v297_v17 }
  0xd1   : > { %v305_v31 = vrot.slane %v236_v28, %v304_v24 }
  0xd2   : > { %v300_v32 = vsel %vm299_vm6, %v298_v29, %v293_v30 }
  0xd3   : > { %v307_v33 = vsel %vm306_vm7, %v305_v31, %v300_v32 }
  0xd4   : > { %664 = vmatmul.mubr.msk.f32.vlgmr.msra.gmra.mxu0 %vm308_vm8, %v307_v33 }
 0x194   : > { %v377_v36 = vpop.f32.mrf.mxu0 }
 0x195   : > { %v381_v37 = vmax.f32 %v377_v36, 0.0 }
 0x196   : > { %v665_v38 = vpop.f32.mrf.mxu0 }
 0x197   : > { %669 = vmatmul.mubr.msk.f32.vlgmr.msra.gmra.mxu1 %vm383_vm9, %v381_v37 }
 0x257   : > { %v453_v39 = vpop.f32.mrf.mxu1 }
 0x258   : > { %v628_v40 = vmul.f32 -1.442695, %v453_v39 }
 0x259   : > { %v670_v41 = vpop.f32.mrf.mxu1 }
 0x25a   : > { %723 = vpow2.f32 %v628_v40 }
 0x267   : > { %v724_v42 = vpop.eup %723 }
 0x268   : > { %v460_v43 = vadd.f32 1.0, %v724_v42 }
 0x26a   : > { %725 = vrcp.f32 %v460_v43 }
 0x277   : > { %v726_v45 = vpop.eup %725 }
 0x278   : > { %v466_v46 = vrot.slane %v726_v45, %v465_v44 }
 0x27a   : > { %472 = vbcast.lane.b32.xlu1 %v466_v46, 264  ;;  %468 = vbcast.lane.b32.xlu0 %v466_v46, 256 }
 0x27e   : > { %476 = vbcast.lane.b32.xlu1 %v466_v46, 272  ;;  %484 = vbcast.lane.b32.xlu0 %v466_v46, 288 }
 0x282   : > { %480 = vbcast.lane.b32.xlu1 %v466_v46, 280  ;;  %492 = vbcast.lane.b32.xlu0 %v466_v46, 304 }
 0x286   : > { %488 = vbcast.lane.b32.xlu1 %v466_v46, 296 }
 0x28a   : > { %496 = vbcast.lane.b32.xlu1 %v466_v46, 312 }
 0x2ec   : > { %v473_v47 = vpop.permute.xlu1 %472  ;;  %v469_v48 = vpop.permute.xlu0 %468 }
 0x2ed   : > { %v500_v49 = vmul.f32 %v473_v47, %v966_v5  ;;  %v501_v50 = vmul.f32 %v473_v47, %v968_v6  ;;  %v498_v51 = vmul.f32 %v469_v48, %v956_v0  ;;  %v499_v35 = vmul.f32 %v469_v48, %v958_v1 }
 0x2ef   : > { %516 = vst [vmem:[%s1049_s6 + $0x10] sm:$0xff] %v500_v49  ;;  %517 = vst [vmem:[%s1049_s6 + $0x18] sm:$0xff] %v501_v50 }
 0x2f0   : > { %514 = vst [vmem:[%s1049_s6] sm:$0xff] %v498_v51  ;;  %515 = vst [vmem:[%s1049_s6 + $0x8] sm:$0xff] %v499_v35  ;;  %v477_v5 = vpop.permute.xlu1 %476  ;;  %v485_v0 = vpop.permute.xlu0 %484 }
 0x2f1   : > { %v502_v1 = vmul.f32 %v477_v5, %v960_v2  ;;  %v503_v6 = vmul.f32 %v477_v5, %v964_v4  ;;  %v506_v52 = vmul.f32 %v485_v0, %v980_v12  ;;  %v507_v53 = vmul.f32 %v485_v0, %v982_v13 }
 0x2f3   : > { %518 = vst [vmem:[%s1049_s6 + $0x20] sm:$0xff] %v502_v1  ;;  %519 = vst [vmem:[%s1049_s6 + $0x28] sm:$0xff] %v503_v6 }
 0x2f4   : > { %522 = vst [vmem:[%s1049_s6 + $0x40] sm:$0xff] %v506_v52  ;;  %523 = vst [vmem:[%s1049_s6 + $0x48] sm:$0xff] %v507_v53  ;;  %v481_v54 = vpop.permute.xlu1 %480  ;;  %v493_v55 = vpop.permute.xlu0 %492 }
 0x2f5   : > { %v504_v2 = vmul.f32 %v481_v54, %v972_v8  ;;  %v505_v56 = vmul.f32 %v481_v54, %v974_v9  ;;  %v510_v4 = vmul.f32 %v493_v55, %v992_v18  ;;  %v511_v12 = vmul.f32 %v493_v55, %v994_v19 }
 0x2f7   : > { %520 = vst [vmem:[%s1049_s6 + $0x30] sm:$0xff] %v504_v2  ;;  %521 = vst [vmem:[%s1049_s6 + $0x38] sm:$0xff] %v505_v56 }
 0x2f8   : > { %526 = vst [vmem:[%s1049_s6 + $0x60] sm:$0xff] %v510_v4  ;;  %527 = vst [vmem:[%s1049_s6 + $0x68] sm:$0xff] %v511_v12  ;;  %v489_v13 = vpop.permute.xlu1 %488 }
 0x2f9   : > { %v508_v57 = vmul.f32 %v489_v13, %v984_v14  ;;  %v509_v58 = vmul.f32 %v489_v13, %v986_v15 }
 0x2fb   : > { %524 = vst [vmem:[%s1049_s6 + $0x50] sm:$0xff] %v508_v57  ;;  %525 = vst [vmem:[%s1049_s6 + $0x58] sm:$0xff] %v509_v58 }
 0x2fc   : > { %v497_v8 = vpop.permute.xlu1 %496 }
 0x2fd   : > { %v512_v9 = vmul.f32 %v497_v8, %v996_v20  ;;  %v513_v14 = vmul.f32 %v497_v8, %v998_v21 }
 0x2ff   : > { %528 = vst [vmem:[%s1049_s6 + $0x70] sm:$0xff] %v512_v9  ;;  %529 = vst [vmem:[%s1049_s6 + $0x78] sm:$0xff] %v513_v14 }
 0x300   : > { %768 = shalt.err (!%p765_p10)
}
 0x301   : > { %s769_s28 = scalar_lea.hbm %s1080_s19, 2048  ;;  %s773_s10 = scalar_lea.hbm %s1132_s3, 4096 }
 0x302   : > { %p770_p0 = scmp.ne.s32.totalorder %s1080_s19, %s769_s28  ;;  %p774_p1 = scmp.lt.s32.totalorder %s1080_s19, %s1132_s3 }
 0x303   : > { %p775_p3 = scmp.lt.s32.totalorder %s773_s10, %s769_s28 }
 0x304   : > { %p771_p2 = pnand %p770_p0, %p1141_p12 }
 0x305   : > { %p776_p6 = por %p775_p3, %p774_p1 }
 0x306   : > { %p772_p9 = pneg %p771_p2 }
 0x308   : > { %p777_p11 = pnand %p776_p6, %p772_p9 }
 0x30a   : > { %780 = shalt.err (!%p777_p11)
}
 0x30b   : > { %s827_s4 = smov 256   ;;  %s828_s6 = smov 16  }
 0x30c   : > { %673 = dma.vmem_to_hbm [thread:$0]  (%p1141_p12), %s1082_s7, 2048, %s1080_s19, %s531_s16, %s827_s4, %s827_s4, %s828_s6  }
 0x30d PF: > { %s559_s9 = sand.u32 1, %s807_s12   ;;  %p1142_p13 = scmp.ne.s32.totalorder %s1138_s25, 0 }
 0x30e   : > { %p1143_p4 = scmp.ge.s32.totalorder %s819_s15, 2  ;;  %s560_s8 = scalar_lea.sflag [#allocation4], %s559_s9 }
 0x310   : > { %p680_p5 = pnand %p1143_p4, %p1142_p13 }
 0x312   : > { %p681_p7 = pneg %p680_p5 }
 0x314   : > { %802 = dma.done.wait (%p681_p7), %s560_s8, 2048  }
 0x315   : > { %804 = vsyncadd (%p681_p7), %s560_s8, 4294965248  ;;  %p16_p8 = scmp.ge.s32.totalorder %s874_s18, 4   ;;  %s1144_s12 = smov %s811_s13 }
 0x316   : > { %s1145_s13 = smov %s815_s14  ;;  %s1146_s14 = smov %s886_s21 }
 0x317   : > { %s1147_s15 = smov %s874_s18  ;;  %18 = sbr.rel (!%p16_p8) target bundleno = 5 (0x5), region = 77 }
 0x31c   :  { %565 = vsyncpa [#allocation3], 1 }
 0x31d   :  { %567 = vsyncpa [#allocation3 + $0x1], 1 }
 0x31e   :  { %568 = vsyncpa [#allocation4], 1 }
 0x31f   :  { %570 = vsyncpa [#allocation4 + $0x1], 1 }

</bundles_post_ra>
